<compile_context>
chip_gen: v7x
topology: tpu7x:2x2x1
jax: 0.10.0
libtpu: 0.0.40
codegen_flags: <defaults>
</compile_context>

<pallas_src>
import functools

import jax
import jax.numpy as jnp
from jax.experimental import pallas as pl
from jax.experimental.pallas import tpu as pltpu


# Column layout of the packed bias buffer ([h+1, _NUM_BIAS_COLS] f32):
#   cols 0..7 : FeaExt layers 0..7 biases           (rows 0..h-1)
#   col  8    : RGB_layer_0 bias (rows 0..h-1) + density bias (row h)
#   col  9    : RGB_layer_1 bias                    (rows 0..h//2-1)
#   col 10    : RGB_layer_2 bias                    (rows 0..res_nfeat-1)
_NUM_BIAS_COLS = 11


# ----------------------------- Pallas kernel ------------------------------ #
def mlp_nerf_kernel(vps_ref, vds_ref, bias_ref,
                    w0, w1, w2, w3, w4, w5a, w5b, w6, w7,
                    wr0d, wr1x, wr1v, wr2,
                    rgb_ref, den_ref, *, h, res_nfeat):
    f32 = jnp.float32
    bf16 = jnp.bfloat16

    biases = bias_ref[...]                    # [h+1, 11] f32 (tiny, resident)

    def bias_col(col, rows):
        # [rows, 1] f32 column, broadcast over the pixel (lane) axis.
        return biases[:rows, col:col + 1]

    def mm(w_ref, x):
        # bf16 MXU matmul, f32 accumulation.
        return jnp.dot(w_ref[...], x, preferred_element_type=f32)

    def relu_bf16(y):
        return jnp.maximum(y, 0.0).astype(bf16)

    # In-kernel cast: inputs arrive in their native dtype; the cast rides the
    # VPU slack under the MXU instead of a separate HBM round trip.
    vps = vps_ref[...].astype(bf16)           # [C1, T]
    vds = vds_ref[...].astype(bf16)           # [C2, T]

    # FeaExt layers 0..4 (ReLU after each)
    x = relu_bf16(mm(w0, vps) + bias_col(0, h))
    x = relu_bf16(mm(w1, x) + bias_col(1, h))
    x = relu_bf16(mm(w2, x) + bias_col(2, h))
    x = relu_bf16(mm(w3, x) + bias_col(3, h))
    x = relu_bf16(mm(w4, x) + bias_col(4, h))

    # skip: cat([vps, x], channel) -> layer 5, implemented as split weights
    x = relu_bf16(mm(w5a, vps) + mm(w5b, x) + bias_col(5, h))

    # FeaExt layers 6, 7
    x = relu_bf16(mm(w6, x) + bias_col(6, h))
    x = relu_bf16(mm(w7, x) + bias_col(7, h))

    # Fused RGB_layer_0 + density head: wr0d is [h+1, h]
    hd = mm(wr0d, x) + bias_col(8, h + 1)     # f32 [h+1, T]
    density = hd[h:h + 1, :]                  # f32 [1, T]
    h_rgb = hd[:h, :].astype(bf16)            # no ReLU after RGB_layer_0

    # RGB_layer_1 on cat([h_rgb, vds], channel) -> split weights, then ReLU
    g = relu_bf16(mm(wr1x, h_rgb) + mm(wr1v, vds) + bias_col(9, h // 2))

    # RGB_layer_2
    rgb = mm(wr2, g) + bias_col(10, res_nfeat)   # f32 [res_nfeat, T]

    den_ref[...] = jnp.maximum(density, 0.0)
    if res_nfeat == 3:
        rgb_ref[...] = jax.nn.sigmoid(rgb)
    else:
        rgb_ref[...] = rgb


# ------------------------------ Parameters -------------------------------- #
def _xavier_uniform(key, c_out, c_in):
    """Xavier-uniform for a 1x1 conv, PyTorch layout [C_out, C_in]."""
    bound = (6.0 / (c_in + c_out)) ** 0.5
    return jax.random.uniform(key, (c_out, c_in), jnp.float32, -bound, bound)


def init_params(key, vp_channels, vd_channels, n_layers=8, h_channel=256,
                res_nfeat=3):
    assert n_layers == 8, "kernel is written for the default n_layers=8"
    h = h_channel
    keys = jax.random.split(key, 16)
    it = iter(keys)
    p = {}
    p["w0"] = _xavier_uniform(next(it), h, vp_channels)
    p["b0"] = jnp.zeros((h,), jnp.float32)
    for i in (1, 2, 3, 4, 6, 7):
        p[f"w{i}"] = _xavier_uniform(next(it), h, h)
        p[f"b{i}"] = jnp.zeros((h,), jnp.float32)
    # layer 5 consumes cat([vps, x]) -> [h, vp + h]
    p["w5"] = _xavier_uniform(next(it), h, h + vp_channels)
    p["b5"] = jnp.zeros((h,), jnp.float32)
    # density head (bias forced to zero, like the module)
    p["wd"] = _xavier_uniform(next(it), 1, h)
    p["bd"] = jnp.zeros((1,), jnp.float32)
    # RGB head
    p["wr0"] = _xavier_uniform(next(it), h, h)
    p["br0"] = jnp.zeros((h,), jnp.float32)
    p["wr1"] = _xavier_uniform(next(it), h // 2, h + vd_channels)
    p["br1"] = jnp.zeros((h // 2,), jnp.float32)
    p["wr2"] = _xavier_uniform(next(it), res_nfeat, h // 2)
    p["br2"] = jnp.zeros((res_nfeat,), jnp.float32)
    return p


def _round_up(x, m):
    return (x + m - 1) // m * m


@functools.lru_cache(maxsize=1)
def _tpu_budget():
    """Pick (max pixel tile, scoped-VMEM limit) from the local chip's VMEM."""
    try:
        vmem_cap = int(pltpu.get_tpu_info().vmem_capacity_bytes)
    except Exception:
        vmem_cap = 64 << 20                      # v7x-safe fallback
    max_tile = 2048 if vmem_cap >= (96 << 20) else 1024   # v5e/v6e vs v7x
    vmem_limit = int(min(max(vmem_cap // 2, 32 << 20), 64 << 20))
    return max_tile, vmem_limit


# ------------------------------- Wrapper ----------------------------------- #
def mlp_nerf_forward(batch_embed_vps, batch_embed_vds, params, res_nfeat=3,
                     max_tile=None):
    """batch_embed_vps: [B, C1, Nr, Ns], batch_embed_vds: [B, C2, Nr, Ns]."""
    B, C1, Nr, Ns = batch_embed_vps.shape
    C2 = batch_embed_vds.shape[1]
    h = params["w0"].shape[0]
    Npix = Nr * Ns

    bf16 = jnp.bfloat16
    f32 = jnp.float32

    tile_default, vmem_limit = _tpu_budget()
    if max_tile is None:
        max_tile = tile_default

    # Pixel tile: multiple of 128.  No wrapper-side padding: the tail tile is
    # handled by masked loads/stores (grid = cdiv).
    T = min(max_tile, _round_up(Npix, 128))
    # v7x megacore: aim for >= 2 grid steps so both TensorCores get work.
    if B * pl.cdiv(Npix, T) < 2 and Npix > 128:
        T = _round_up(pl.cdiv(Npix, 2), 128)
    num_tiles = pl.cdiv(Npix, T)
    grid = (B, num_tiles)

    # NCHW -> [B, C, Npix]: free reshape, no transpose, no cast, no pad.
    vps = batch_embed_vps.reshape(B, C1, Npix)
    vds = batch_embed_vds.reshape(B, C2, Npix)

    p = params

    def wcast(w):
        return w.astype(bf16)

    # Fused RGB_layer_0 + density head weights.
    wr0d = jnp.concatenate([p["wr0"], p["wd"]], axis=0)        # [h+1, h]

    weights = [
        wcast(p["w0"]), wcast(p["w1"]), wcast(p["w2"]), wcast(p["w3"]),
        wcast(p["w4"]),
        wcast(p["w5"][:, :C1]), wcast(p["w5"][:, C1:]),
        wcast(p["w6"]), wcast(p["w7"]),
        wcast(wr0d),
        wcast(p["wr1"][:, :h]), wcast(p["wr1"][:, h:]),
        wcast(p["wr2"]),
    ]

    # Pack all biases into one f32 [h+1, 11] buffer (one lane column each).
    def _col(v):
        return jnp.pad(v.astype(f32), (0, (h + 1) - v.shape[0]))

    bias_pack = jnp.stack(
        [_col(p[f"b{i}"]) for i in range(8)]
        + [jnp.concatenate([p["br0"], p["bd"]]).astype(f32),   # col 8: [h+1]
           _col(p["br1"]), _col(p["br2"])],
        axis=1)                                                # [h+1, 11]
    assert bias_pack.shape == (h + 1, _NUM_BIAS_COLS)

    # Grid-invariant operands: whole array resident in VMEM (single copy,
    # no per-step DMA and no double-buffering).
    resident = pl.BlockSpec(memory_space=pltpu.MemorySpace.VMEM)

    in_specs = [
        pl.BlockSpec((None, C1, T), lambda b, i: (b, 0, i)),
        pl.BlockSpec((None, C2, T), lambda b, i: (b, 0, i)),
        resident,                                   # packed biases
    ] + [resident] * len(weights)

    out_specs = [
        pl.BlockSpec((None, res_nfeat, T), lambda b, i: (b, 0, i)),
        pl.BlockSpec((None, 1, T), lambda b, i: (b, 0, i)),
    ]
    out_shape = [
        jax.ShapeDtypeStruct((B, res_nfeat, Npix), f32),
        jax.ShapeDtypeStruct((B, 1, Npix), f32),
    ]

    # Advisory cost estimate (compute-bound MLP).
    n_tot = B * Npix
    flops_per_pix = 2 * (C1 * h + 4 * h * h + (C1 + h) * h + 2 * h * h
                         + h * (h + 1) + (h + C2) * (h // 2)
                         + (h // 2) * res_nfeat)
    weight_bytes = (sum(int(w.size) * w.dtype.itemsize for w in weights)
                    + int(bias_pack.size) * 4)
    in_bytes = (batch_embed_vps.dtype.itemsize * C1
                + batch_embed_vds.dtype.itemsize * C2)
    cost = pl.CostEstimate(
        flops=int(flops_per_pix * n_tot),
        transcendentals=int(n_tot * res_nfeat) if res_nfeat == 3 else 0,
        bytes_accessed=int(n_tot * in_bytes + n_tot * (res_nfeat + 1) * 4
                           + weight_bytes),
    )

    rgb_flat, den_flat = pl.pallas_call(
        functools.partial(mlp_nerf_kernel, h=h, res_nfeat=res_nfeat),
        out_shape=out_shape,
        grid=grid,
        in_specs=in_specs,
        out_specs=out_specs,
        compiler_params=pltpu.CompilerParams(
            dimension_semantics=("parallel", "parallel"),
            vmem_limit_bytes=vmem_limit),
        cost_estimate=cost,
    )(vps, vds, bias_pack, *weights)

    rgb = rgb_flat.reshape(B, res_nfeat, Nr, Ns)
    density = den_flat.reshape(B, 1, Nr, Ns)
    return rgb, density


# --------------------------- Pure-JAX reference ---------------------------- #
def ref_forward(batch_embed_vps, batch_embed_vds, params, res_nfeat=3):
    """Same math (bf16 matmuls, f32 accumulation), built with explicit concats."""
    bf16 = jnp.bfloat16
    B, C1, Nr, Ns = batch_embed_vps.shape
    N = Nr * Ns
    vps = batch_embed_vps.reshape(B, C1, N)
    vds = batch_embed_vds.reshape(B, batch_embed_vds.shape[1], N)
    p = params

    def conv1x1(w, b, x):
        y = jnp.einsum("oc,bcn->bon", w.astype(bf16), x.astype(bf16),
                       preferred_element_type=jnp.float32)
        return y + b[None, :, None]

    x = vps
    for i in range(8):
        x = jax.nn.relu(conv1x1(p[f"w{i}"], p[f"b{i}"], x))
        if i == 4:
            x = jnp.concatenate([vps, x], axis=1)

    density = jax.nn.relu(conv1x1(p["wd"], p["bd"], x))
    x = conv1x1(p["wr0"], p["br0"], x)
    x = jax.nn.relu(conv1x1(p["wr1"], p["br1"],
                            jnp.concatenate([x, vds], axis=1)))
    rgb = conv1x1(p["wr2"], p["br2"], x)
    if res_nfeat == 3:
        rgb = jax.nn.sigmoid(rgb)
    return (rgb.reshape(B, res_nfeat, Nr, Ns),
            density.reshape(B, 1, Nr, Ns))


# --------------------------------- Main ------------------------------------ #
if __name__ == "__main__":
    # Small synthetic config: vp_channels=8, vd_channels=8, h_channel=32,
    # n_layers=8, res_nfeat=3; inputs [B=2, C, N_r=16, N_s=8].
    vp_channels, vd_channels = 8, 8
    h_channel, n_layers, res_nfeat = 32, 8, 3
    B, Nr, Ns = 2, 16, 8

    key = jax.random.PRNGKey(0)
    k_p, k_vp, k_vd = jax.random.split(key, 3)

    params = init_params(k_p, vp_channels, vd_channels, n_layers, h_channel,
                         res_nfeat)
    batch_embed_vps = jax.random.normal(k_vp, (B, vp_channels, Nr, Ns),
                                        jnp.float32)
    batch_embed_vds = jax.random.normal(k_vd, (B, vd_channels, Nr, Ns),
                                        jnp.float32)

    rgb, density = mlp_nerf_forward(batch_embed_vps, batch_embed_vds, params,
                                    res_nfeat)
    jax.block_until_ready((rgb, density))

    rgb_expected, den_expected = ref_forward(batch_embed_vps, batch_embed_vds,
                                             params, res_nfeat)

    assert rgb.shape == (B, res_nfeat, Nr, Ns)
    assert density.shape == (B, 1, Nr, Ns)
    # TODO(synk): at production h=256 the bf16 accumulation chain is deeper;
    # re-validate tolerance at real sizes before benchmarking.
    assert jnp.allclose(rgb, rgb_expected, atol=1e-3, rtol=1e-3)
    assert jnp.allclose(density, den_expected, atol=1e-3, rtol=1e-3)

    print("KERNEL_OK")
</pallas_src>

<mosaic_0001>
module attributes {stable_mosaic.version = 11 : i64} {
  func.func @mlp_nerf_kernel(%arg0: i32, %arg1: i32, %arg2: memref<1x8x128xf32, #tpu.memory_space<vmem>>, %arg3: memref<1x8x128xf32, #tpu.memory_space<vmem>>, %arg4: memref<33x11xf32, #tpu.memory_space<vmem>>, %arg5: memref<32x8xbf16, #tpu.memory_space<vmem>>, %arg6: memref<32x32xbf16, #tpu.memory_space<vmem>>, %arg7: memref<32x32xbf16, #tpu.memory_space<vmem>>, %arg8: memref<32x32xbf16, #tpu.memory_space<vmem>>, %arg9: memref<32x32xbf16, #tpu.memory_space<vmem>>, %arg10: memref<32x8xbf16, #tpu.memory_space<vmem>>, %arg11: memref<32x32xbf16, #tpu.memory_space<vmem>>, %arg12: memref<32x32xbf16, #tpu.memory_space<vmem>>, %arg13: memref<32x32xbf16, #tpu.memory_space<vmem>>, %arg14: memref<33x32xbf16, #tpu.memory_space<vmem>>, %arg15: memref<16x32xbf16, #tpu.memory_space<vmem>>, %arg16: memref<16x8xbf16, #tpu.memory_space<vmem>>, %arg17: memref<3x16xbf16, #tpu.memory_space<vmem>>, %arg18: memref<1x3x128xf32, #tpu.memory_space<vmem>>, %arg19: memref<1x1x128xf32, #tpu.memory_space<vmem>>) attributes {dimension_semantics = [#tpu.dimension_semantics<parallel>, #tpu.dimension_semantics<parallel>], iteration_bounds = array<i64: 2, 1>, scalar_prefetch = 0 : i64, scratch_operands = 0 : i64, tpu.core_type = #tpu.core_type<tc>, window_params = [{transform_indices = @transform_0, window_bounds = array<i64: 1, 8, 128>}, {transform_indices = @transform_1, window_bounds = array<i64: 1, 8, 128>}, {pipeline_mode = #tpu.pipeline_mode<synchronous>, transform_indices = @transform_2, window_bounds = array<i64: 33, 11>}, {pipeline_mode = #tpu.pipeline_mode<synchronous>, transform_indices = @transform_3, window_bounds = array<i64: 32, 8>}, {pipeline_mode = #tpu.pipeline_mode<synchronous>, transform_indices = @transform_4, window_bounds = array<i64: 32, 32>}, {pipeline_mode = #tpu.pipeline_mode<synchronous>, transform_indices = @transform_5, window_bounds = array<i64: 32, 32>}, {pipeline_mode = #tpu.pipeline_mode<synchronous>, transform_indices = @transform_6, window_bounds = array<i64: 32, 32>}, {pipeline_mode = #tpu.pipeline_mode<synchronous>, transform_indices = @transform_7, window_bounds = array<i64: 32, 32>}, {pipeline_mode = #tpu.pipeline_mode<synchronous>, transform_indices = @transform_8, window_bounds = array<i64: 32, 8>}, {pipeline_mode = #tpu.pipeline_mode<synchronous>, transform_indices = @transform_9, window_bounds = array<i64: 32, 32>}, {pipeline_mode = #tpu.pipeline_mode<synchronous>, transform_indices = @transform_10, window_bounds = array<i64: 32, 32>}, {pipeline_mode = #tpu.pipeline_mode<synchronous>, transform_indices = @transform_11, window_bounds = array<i64: 32, 32>}, {pipeline_mode = #tpu.pipeline_mode<synchronous>, transform_indices = @transform_12, window_bounds = array<i64: 33, 32>}, {pipeline_mode = #tpu.pipeline_mode<synchronous>, transform_indices = @transform_13, window_bounds = array<i64: 16, 32>}, {pipeline_mode = #tpu.pipeline_mode<synchronous>, transform_indices = @transform_14, window_bounds = array<i64: 16, 8>}, {pipeline_mode = #tpu.pipeline_mode<synchronous>, transform_indices = @transform_15, window_bounds = array<i64: 3, 16>}, {transform_indices = @transform_16, window_bounds = array<i64: 1, 3, 128>}, {transform_indices = @transform_17, window_bounds = array<i64: 1, 1, 128>}]} {
    %c0 = arith.constant 0 : index
    %c0_0 = arith.constant 0 : index
    %0 = vector.load %arg4[%c0, %c0_0] : memref<33x11xf32, #tpu.memory_space<vmem>>, vector<33x11xf32>
    %c0_1 = arith.constant 0 : index
    %c0_2 = arith.constant 0 : index
    %c0_3 = arith.constant 0 : index
    %1 = vector.load %arg2[%c0_1, %c0_2, %c0_3] : memref<1x8x128xf32, #tpu.memory_space<vmem>>, vector<1x8x128xf32>
    %2 = vector.shape_cast %1 : vector<1x8x128xf32> to vector<8x128xf32>
    %3 = arith.truncf %2 : vector<8x128xf32> to vector<8x128xbf16>
    %c0_4 = arith.constant 0 : index
    %c0_5 = arith.constant 0 : index
    %c0_6 = arith.constant 0 : index
    %4 = vector.load %arg3[%c0_4, %c0_5, %c0_6] : memref<1x8x128xf32, #tpu.memory_space<vmem>>, vector<1x8x128xf32>
    %5 = vector.shape_cast %4 : vector<1x8x128xf32> to vector<8x128xf32>
    %6 = arith.truncf %5 : vector<8x128xf32> to vector<8x128xbf16>
    %c0_7 = arith.constant 0 : index
    %c0_8 = arith.constant 0 : index
    %7 = vector.load %arg5[%c0_7, %c0_8] : memref<32x8xbf16, #tpu.memory_space<vmem>>, vector<32x8xbf16>
    %cst = arith.constant dense<0.000000e+00> : vector<32x128xf32>
    %8 = tpu.matmul %7, %3, %cst {dimension_numbers = #tpu.dot_dimension_numbers<[1], [0], [0], [1], [0, 0, 1, 1], [], []>} : vector<32x8xbf16>, vector<8x128xbf16>, vector<32x128xf32> -> vector<32x128xf32>
    %9 = vector.extract_strided_slice %0 {offsets = [0, 0], sizes = [32, 1], strides = [1, 1]} : vector<33x11xf32> to vector<32x1xf32>
    %10 = vector.broadcast %9 : vector<32x1xf32> to vector<32x128xf32>
    %11 = arith.addf %8, %10 : vector<32x128xf32>
    %cst_9 = arith.constant 0.000000e+00 : f32
    %12 = vector.broadcast %cst_9 : f32 to vector<32x128xf32>
    %13 = arith.maximumf %11, %12 : vector<32x128xf32>
    %14 = arith.truncf %13 : vector<32x128xf32> to vector<32x128xbf16>
    %c0_10 = arith.constant 0 : index
    %c0_11 = arith.constant 0 : index
    %15 = vector.load %arg6[%c0_10, %c0_11] : memref<32x32xbf16, #tpu.memory_space<vmem>>, vector<32x32xbf16>
    %cst_12 = arith.constant dense<0.000000e+00> : vector<32x128xf32>
    %16 = tpu.matmul %15, %14, %cst_12 {dimension_numbers = #tpu.dot_dimension_numbers<[1], [0], [0], [1], [0, 0, 1, 1], [], []>} : vector<32x32xbf16>, vector<32x128xbf16>, vector<32x128xf32> -> vector<32x128xf32>
    %17 = vector.extract_strided_slice %0 {offsets = [0, 1], sizes = [32, 1], strides = [1, 1]} : vector<33x11xf32> to vector<32x1xf32>
    %18 = vector.broadcast %17 : vector<32x1xf32> to vector<32x128xf32>
    %19 = arith.addf %16, %18 : vector<32x128xf32>
    %cst_13 = arith.constant 0.000000e+00 : f32
    %20 = vector.broadcast %cst_13 : f32 to vector<32x128xf32>
    %21 = arith.maximumf %19, %20 : vector<32x128xf32>
    %22 = arith.truncf %21 : vector<32x128xf32> to vector<32x128xbf16>
    %c0_14 = arith.constant 0 : index
    %c0_15 = arith.constant 0 : index
    %23 = vector.load %arg7[%c0_14, %c0_15] : memref<32x32xbf16, #tpu.memory_space<vmem>>, vector<32x32xbf16>
    %cst_16 = arith.constant dense<0.000000e+00> : vector<32x128xf32>
    %24 = tpu.matmul %23, %22, %cst_16 {dimension_numbers = #tpu.dot_dimension_numbers<[1], [0], [0], [1], [0, 0, 1, 1], [], []>} : vector<32x32xbf16>, vector<32x128xbf16>, vector<32x128xf32> -> vector<32x128xf32>
    %25 = vector.extract_strided_slice %0 {offsets = [0, 2], sizes = [32, 1], strides = [1, 1]} : vector<33x11xf32> to vector<32x1xf32>
    %26 = vector.broadcast %25 : vector<32x1xf32> to vector<32x128xf32>
    %27 = arith.addf %24, %26 : vector<32x128xf32>
    %cst_17 = arith.constant 0.000000e+00 : f32
    %28 = vector.broadcast %cst_17 : f32 to vector<32x128xf32>
    %29 = arith.maximumf %27, %28 : vector<32x128xf32>
    %30 = arith.truncf %29 : vector<32x128xf32> to vector<32x128xbf16>
    %c0_18 = arith.constant 0 : index
    %c0_19 = arith.constant 0 : index
    %31 = vector.load %arg8[%c0_18, %c0_19] : memref<32x32xbf16, #tpu.memory_space<vmem>>, vector<32x32xbf16>
    %cst_20 = arith.constant dense<0.000000e+00> : vector<32x128xf32>
    %32 = tpu.matmul %31, %30, %cst_20 {dimension_numbers = #tpu.dot_dimension_numbers<[1], [0], [0], [1], [0, 0, 1, 1], [], []>} : vector<32x32xbf16>, vector<32x128xbf16>, vector<32x128xf32> -> vector<32x128xf32>
    %33 = vector.extract_strided_slice %0 {offsets = [0, 3], sizes = [32, 1], strides = [1, 1]} : vector<33x11xf32> to vector<32x1xf32>
    %34 = vector.broadcast %33 : vector<32x1xf32> to vector<32x128xf32>
    %35 = arith.addf %32, %34 : vector<32x128xf32>
    %cst_21 = arith.constant 0.000000e+00 : f32
    %36 = vector.broadcast %cst_21 : f32 to vector<32x128xf32>
    %37 = arith.maximumf %35, %36 : vector<32x128xf32>
    %38 = arith.truncf %37 : vector<32x128xf32> to vector<32x128xbf16>
    %c0_22 = arith.constant 0 : index
    %c0_23 = arith.constant 0 : index
    %39 = vector.load %arg9[%c0_22, %c0_23] : memref<32x32xbf16, #tpu.memory_space<vmem>>, vector<32x32xbf16>
    %cst_24 = arith.constant dense<0.000000e+00> : vector<32x128xf32>
    %40 = tpu.matmul %39, %38, %cst_24 {dimension_numbers = #tpu.dot_dimension_numbers<[1], [0], [0], [1], [0, 0, 1, 1], [], []>} : vector<32x32xbf16>, vector<32x128xbf16>, vector<32x128xf32> -> vector<32x128xf32>
    %41 = vector.extract_strided_slice %0 {offsets = [0, 4], sizes = [32, 1], strides = [1, 1]} : vector<33x11xf32> to vector<32x1xf32>
    %42 = vector.broadcast %41 : vector<32x1xf32> to vector<32x128xf32>
    %43 = arith.addf %40, %42 : vector<32x128xf32>
    %cst_25 = arith.constant 0.000000e+00 : f32
    %44 = vector.broadcast %cst_25 : f32 to vector<32x128xf32>
    %45 = arith.maximumf %43, %44 : vector<32x128xf32>
    %46 = arith.truncf %45 : vector<32x128xf32> to vector<32x128xbf16>
    %c0_26 = arith.constant 0 : index
    %c0_27 = arith.constant 0 : index
    %47 = vector.load %arg10[%c0_26, %c0_27] : memref<32x8xbf16, #tpu.memory_space<vmem>>, vector<32x8xbf16>
    %cst_28 = arith.constant dense<0.000000e+00> : vector<32x128xf32>
    %48 = tpu.matmul %47, %3, %cst_28 {dimension_numbers = #tpu.dot_dimension_numbers<[1], [0], [0], [1], [0, 0, 1, 1], [], []>} : vector<32x8xbf16>, vector<8x128xbf16>, vector<32x128xf32> -> vector<32x128xf32>
    %c0_29 = arith.constant 0 : index
    %c0_30 = arith.constant 0 : index
    %49 = vector.load %arg11[%c0_29, %c0_30] : memref<32x32xbf16, #tpu.memory_space<vmem>>, vector<32x32xbf16>
    %cst_31 = arith.constant dense<0.000000e+00> : vector<32x128xf32>
    %50 = tpu.matmul %49, %46, %cst_31 {dimension_numbers = #tpu.dot_dimension_numbers<[1], [0], [0], [1], [0, 0, 1, 1], [], []>} : vector<32x32xbf16>, vector<32x128xbf16>, vector<32x128xf32> -> vector<32x128xf32>
    %51 = arith.addf %48, %50 : vector<32x128xf32>
    %52 = vector.extract_strided_slice %0 {offsets = [0, 5], sizes = [32, 1], strides = [1, 1]} : vector<33x11xf32> to vector<32x1xf32>
    %53 = vector.broadcast %52 : vector<32x1xf32> to vector<32x128xf32>
    %54 = arith.addf %51, %53 : vector<32x128xf32>
    %cst_32 = arith.constant 0.000000e+00 : f32
    %55 = vector.broadcast %cst_32 : f32 to vector<32x128xf32>
    %56 = arith.maximumf %54, %55 : vector<32x128xf32>
    %57 = arith.truncf %56 : vector<32x128xf32> to vector<32x128xbf16>
    %c0_33 = arith.constant 0 : index
    %c0_34 = arith.constant 0 : index
    %58 = vector.load %arg12[%c0_33, %c0_34] : memref<32x32xbf16, #tpu.memory_space<vmem>>, vector<32x32xbf16>
    %cst_35 = arith.constant dense<0.000000e+00> : vector<32x128xf32>
    %59 = tpu.matmul %58, %57, %cst_35 {dimension_numbers = #tpu.dot_dimension_numbers<[1], [0], [0], [1], [0, 0, 1, 1], [], []>} : vector<32x32xbf16>, vector<32x128xbf16>, vector<32x128xf32> -> vector<32x128xf32>
    %60 = vector.extract_strided_slice %0 {offsets = [0, 6], sizes = [32, 1], strides = [1, 1]} : vector<33x11xf32> to vector<32x1xf32>
    %61 = vector.broadcast %60 : vector<32x1xf32> to vector<32x128xf32>
    %62 = arith.addf %59, %61 : vector<32x128xf32>
    %cst_36 = arith.constant 0.000000e+00 : f32
    %63 = vector.broadcast %cst_36 : f32 to vector<32x128xf32>
    %64 = arith.maximumf %62, %63 : vector<32x128xf32>
    %65 = arith.truncf %64 : vector<32x128xf32> to vector<32x128xbf16>
    %c0_37 = arith.constant 0 : index
    %c0_38 = arith.constant 0 : index
    %66 = vector.load %arg13[%c0_37, %c0_38] : memref<32x32xbf16, #tpu.memory_space<vmem>>, vector<32x32xbf16>
    %cst_39 = arith.constant dense<0.000000e+00> : vector<32x128xf32>
    %67 = tpu.matmul %66, %65, %cst_39 {dimension_numbers = #tpu.dot_dimension_numbers<[1], [0], [0], [1], [0, 0, 1, 1], [], []>} : vector<32x32xbf16>, vector<32x128xbf16>, vector<32x128xf32> -> vector<32x128xf32>
    %68 = vector.extract_strided_slice %0 {offsets = [0, 7], sizes = [32, 1], strides = [1, 1]} : vector<33x11xf32> to vector<32x1xf32>
    %69 = vector.broadcast %68 : vector<32x1xf32> to vector<32x128xf32>
    %70 = arith.addf %67, %69 : vector<32x128xf32>
    %cst_40 = arith.constant 0.000000e+00 : f32
    %71 = vector.broadcast %cst_40 : f32 to vector<32x128xf32>
    %72 = arith.maximumf %70, %71 : vector<32x128xf32>
    %73 = arith.truncf %72 : vector<32x128xf32> to vector<32x128xbf16>
    %c0_41 = arith.constant 0 : index
    %c0_42 = arith.constant 0 : index
    %74 = vector.load %arg14[%c0_41, %c0_42] : memref<33x32xbf16, #tpu.memory_space<vmem>>, vector<33x32xbf16>
    %cst_43 = arith.constant dense<0.000000e+00> : vector<33x128xf32>
    %75 = tpu.matmul %74, %73, %cst_43 {dimension_numbers = #tpu.dot_dimension_numbers<[1], [0], [0], [1], [0, 0, 1, 1], [], []>} : vector<33x32xbf16>, vector<32x128xbf16>, vector<33x128xf32> -> vector<33x128xf32>
    %76 = vector.extract_strided_slice %0 {offsets = [0, 8], sizes = [33, 1], strides = [1, 1]} : vector<33x11xf32> to vector<33x1xf32>
    %77 = vector.broadcast %76 : vector<33x1xf32> to vector<33x128xf32>
    %78 = arith.addf %75, %77 : vector<33x128xf32>
    %79 = vector.extract_strided_slice %78 {offsets = [32, 0], sizes = [1, 128], strides = [1, 1]} : vector<33x128xf32> to vector<1x128xf32>
    %80 = vector.extract_strided_slice %78 {offsets = [0, 0], sizes = [32, 128], strides = [1, 1]} : vector<33x128xf32> to vector<32x128xf32>
    %81 = arith.truncf %80 : vector<32x128xf32> to vector<32x128xbf16>
    %c0_44 = arith.constant 0 : index
    %c0_45 = arith.constant 0 : index
    %82 = vector.load %arg15[%c0_44, %c0_45] : memref<16x32xbf16, #tpu.memory_space<vmem>>, vector<16x32xbf16>
    %cst_46 = arith.constant dense<0.000000e+00> : vector<16x128xf32>
    %83 = tpu.matmul %82, %81, %cst_46 {dimension_numbers = #tpu.dot_dimension_numbers<[1], [0], [0], [1], [0, 0, 1, 1], [], []>} : vector<16x32xbf16>, vector<32x128xbf16>, vector<16x128xf32> -> vector<16x128xf32>
    %c0_47 = arith.constant 0 : index
    %c0_48 = arith.constant 0 : index
    %84 = vector.load %arg16[%c0_47, %c0_48] : memref<16x8xbf16, #tpu.memory_space<vmem>>, vector<16x8xbf16>
    %cst_49 = arith.constant dense<0.000000e+00> : vector<16x128xf32>
    %85 = tpu.matmul %84, %6, %cst_49 {dimension_numbers = #tpu.dot_dimension_numbers<[1], [0], [0], [1], [0, 0, 1, 1], [], []>} : vector<16x8xbf16>, vector<8x128xbf16>, vector<16x128xf32> -> vector<16x128xf32>
    %86 = arith.addf %83, %85 : vector<16x128xf32>
    %87 = vector.extract_strided_slice %0 {offsets = [0, 9], sizes = [16, 1], strides = [1, 1]} : vector<33x11xf32> to vector<16x1xf32>
    %88 = vector.broadcast %87 : vector<16x1xf32> to vector<16x128xf32>
    %89 = arith.addf %86, %88 : vector<16x128xf32>
    %cst_50 = arith.constant 0.000000e+00 : f32
    %90 = vector.broadcast %cst_50 : f32 to vector<16x128xf32>
    %91 = arith.maximumf %89, %90 : vector<16x128xf32>
    %92 = arith.truncf %91 : vector<16x128xf32> to vector<16x128xbf16>
    %c0_51 = arith.constant 0 : index
    %c0_52 = arith.constant 0 : index
    %93 = vector.load %arg17[%c0_51, %c0_52] : memref<3x16xbf16, #tpu.memory_space<vmem>>, vector<3x16xbf16>
    %cst_53 = arith.constant dense<0.000000e+00> : vector<3x128xf32>
    %94 = tpu.matmul %93, %92, %cst_53 {dimension_numbers = #tpu.dot_dimension_numbers<[1], [0], [0], [1], [0, 0, 1, 1], [], []>} : vector<3x16xbf16>, vector<16x128xbf16>, vector<3x128xf32> -> vector<3x128xf32>
    %95 = vector.extract_strided_slice %0 {offsets = [0, 10], sizes = [3, 1], strides = [1, 1]} : vector<33x11xf32> to vector<3x1xf32>
    %96 = vector.broadcast %95 : vector<3x1xf32> to vector<3x128xf32>
    %97 = arith.addf %94, %96 : vector<3x128xf32>
    %cst_54 = arith.constant 0.000000e+00 : f32
    %98 = vector.broadcast %cst_54 : f32 to vector<1x128xf32>
    %99 = arith.maximumf %79, %98 : vector<1x128xf32>
    %c0_55 = arith.constant 0 : index
    %c0_56 = arith.constant 0 : index
    %c0_57 = arith.constant 0 : index
    %100 = vector.load %arg19[%c0_55, %c0_56, %c0_57] : memref<1x1x128xf32, #tpu.memory_space<vmem>>, vector<1x1x128xf32>
    %101 = vector.shape_cast %100 : vector<1x1x128xf32> to vector<1x128xf32>
    %102 = vector.shape_cast %99 : vector<1x128xf32> to vector<1x1x128xf32>
    tpu.vector_store %arg19[%c0_55, %c0_56, %c0_57], %102 {strides = array<i32>} : memref<1x1x128xf32, #tpu.memory_space<vmem>>, vector<1x1x128xf32>,
    %103 = arith.negf %97 : vector<3x128xf32>
    %104 = math.exp %103 : vector<3x128xf32>
    %cst_58 = arith.constant 1.000000e+00 : f32
    %105 = vector.broadcast %cst_58 : f32 to vector<3x128xf32>
    %106 = arith.addf %105, %104 : vector<3x128xf32>
    %107 = arith.divf %105, %106 : vector<3x128xf32>
    %c0_59 = arith.constant 0 : index
    %c0_60 = arith.constant 0 : index
    %c0_61 = arith.constant 0 : index
    %108 = vector.load %arg18[%c0_59, %c0_60, %c0_61] : memref<1x3x128xf32, #tpu.memory_space<vmem>>, vector<1x3x128xf32>
    %109 = vector.shape_cast %108 : vector<1x3x128xf32> to vector<3x128xf32>
    %110 = vector.shape_cast %107 : vector<3x128xf32> to vector<1x3x128xf32>
    tpu.vector_store %arg18[%c0_59, %c0_60, %c0_61], %110 {strides = array<i32>} : memref<1x3x128xf32, #tpu.memory_space<vmem>>, vector<1x3x128xf32>,
    return
  }
  func.func @transform_0(%arg0: i32, %arg1: i32) -> (i32, i32, i32) {
    %c0_i32 = arith.constant 0 : i32
    %c0_i32_0 = arith.constant 0 : i32
    return %arg0, %c0_i32, %arg1 : i32, i32, i32
  }
  func.func @transform_1(%arg0: i32, %arg1: i32) -> (i32, i32, i32) {
    %c0_i32 = arith.constant 0 : i32
    %c0_i32_0 = arith.constant 0 : i32
    return %arg0, %c0_i32, %arg1 : i32, i32, i32
  }
  func.func @transform_2(%arg0: i32, %arg1: i32) -> (i32, i32) {
    %c0_i32 = arith.constant 0 : i32
    %c0_i32_0 = arith.constant 0 : i32
    %c0_i32_1 = arith.constant 0 : i32
    return %c0_i32, %c0_i32_0 : i32, i32
  }
  func.func @transform_3(%arg0: i32, %arg1: i32) -> (i32, i32) {
    %c0_i32 = arith.constant 0 : i32
    %c0_i32_0 = arith.constant 0 : i32
    %c0_i32_1 = arith.constant 0 : i32
    return %c0_i32, %c0_i32_0 : i32, i32
  }
  func.func @transform_4(%arg0: i32, %arg1: i32) -> (i32, i32) {
    %c0_i32 = arith.constant 0 : i32
    %c0_i32_0 = arith.constant 0 : i32
    %c0_i32_1 = arith.constant 0 : i32
    return %c0_i32, %c0_i32_0 : i32, i32
  }
  func.func @transform_5(%arg0: i32, %arg1: i32) -> (i32, i32) {
    %c0_i32 = arith.constant 0 : i32
    %c0_i32_0 = arith.constant 0 : i32
    %c0_i32_1 = arith.constant 0 : i32
    return %c0_i32, %c0_i32_0 : i32, i32
  }
  func.func @transform_6(%arg0: i32, %arg1: i32) -> (i32, i32) {
    %c0_i32 = arith.constant 0 : i32
    %c0_i32_0 = arith.constant 0 : i32
    %c0_i32_1 = arith.constant 0 : i32
    return %c0_i32, %c0_i32_0 : i32, i32
  }
  func.func @transform_7(%arg0: i32, %arg1: i32) -> (i32, i32) {
    %c0_i32 = arith.constant 0 : i32
    %c0_i32_0 = arith.constant 0 : i32
    %c0_i32_1 = arith.constant 0 : i32
    return %c0_i32, %c0_i32_0 : i32, i32
  }
  func.func @transform_8(%arg0: i32, %arg1: i32) -> (i32, i32) {
    %c0_i32 = arith.constant 0 : i32
    %c0_i32_0 = arith.constant 0 : i32
    %c0_i32_1 = arith.constant 0 : i32
    return %c0_i32, %c0_i32_0 : i32, i32
  }
  func.func @transform_9(%arg0: i32, %arg1: i32) -> (i32, i32) {
    %c0_i32 = arith.constant 0 : i32
    %c0_i32_0 = arith.constant 0 : i32
    %c0_i32_1 = arith.constant 0 : i32
    return %c0_i32, %c0_i32_0 : i32, i32
  }
  func.func @transform_10(%arg0: i32, %arg1: i32) -> (i32, i32) {
    %c0_i32 = arith.constant 0 : i32
    %c0_i32_0 = arith.constant 0 : i32
    %c0_i32_1 = arith.constant 0 : i32
    return %c0_i32, %c0_i32_0 : i32, i32
  }
  func.func @transform_11(%arg0: i32, %arg1: i32) -> (i32, i32) {
    %c0_i32 = arith.constant 0 : i32
    %c0_i32_0 = arith.constant 0 : i32
    %c0_i32_1 = arith.constant 0 : i32
    return %c0_i32, %c0_i32_0 : i32, i32
  }
  func.func @transform_12(%arg0: i32, %arg1: i32) -> (i32, i32) {
    %c0_i32 = arith.constant 0 : i32
    %c0_i32_0 = arith.constant 0 : i32
    %c0_i32_1 = arith.constant 0 : i32
    return %c0_i32, %c0_i32_0 : i32, i32
  }
  func.func @transform_13(%arg0: i32, %arg1: i32) -> (i32, i32) {
    %c0_i32 = arith.constant 0 : i32
    %c0_i32_0 = arith.constant 0 : i32
    %c0_i32_1 = arith.constant 0 : i32
    return %c0_i32, %c0_i32_0 : i32, i32
  }
  func.func @transform_14(%arg0: i32, %arg1: i32) -> (i32, i32) {
    %c0_i32 = arith.constant 0 : i32
    %c0_i32_0 = arith.constant 0 : i32
    %c0_i32_1 = arith.constant 0 : i32
    return %c0_i32, %c0_i32_0 : i32, i32
  }
  func.func @transform_15(%arg0: i32, %arg1: i32) -> (i32, i32) {
    %c0_i32 = arith.constant 0 : i32
    %c0_i32_0 = arith.constant 0 : i32
    %c0_i32_1 = arith.constant 0 : i32
    return %c0_i32, %c0_i32_0 : i32, i32
  }
  func.func @transform_16(%arg0: i32, %arg1: i32) -> (i32, i32, i32) {
    %c0_i32 = arith.constant 0 : i32
    %c0_i32_0 = arith.constant 0 : i32
    return %arg0, %c0_i32, %arg1 : i32, i32, i32
  }
  func.func @transform_17(%arg0: i32, %arg1: i32) -> (i32, i32, i32) {
    %c0_i32 = arith.constant 0 : i32
    %c0_i32_0 = arith.constant 0 : i32
    return %arg0, %c0_i32, %arg1 : i32, i32, i32
  }
}

</mosaic_0001>

<bundles_post_ra>
// kernel: tpu_custom_call.1
= control target key start
LH: loop header
LB: loop body
LE: loop exit
PB: predicated region body
PF: predicated region fallthrough
CT: control target
= control target key end

     0   :  { %s2680_s0 = inlined_call_operand.vmem [shape: f32[2,8,128], index: 0, kind: input, shape index: {}]   ;;  %s2681_s1 = inlined_call_operand.vmem [shape: f32[2,8,128], index: 1, kind: input, shape index: {}]   ;;  %s2682_s2 = inlined_call_operand.vmem [shape: f32[33,11], index: 2, kind: input, shape index: {}]   ;;  %s2683_s3 = inlined_call_operand.vmem [shape: bf16[32,8], index: 3, kind: input, shape index: {}]   ;;  %s2684_s4 = inlined_call_operand.vmem [shape: bf16[32,32], index: 4, kind: input, shape index: {}]   ;;  %s2685_s5 = inlined_call_operand.vmem [shape: bf16[32,32], index: 5, kind: input, shape index: {}]   ;;  %s2686_s6 = inlined_call_operand.vmem [shape: bf16[32,32], index: 6, kind: input, shape index: {}]   ;;  %s2687_s7 = inlined_call_operand.vmem [shape: bf16[32,32], index: 7, kind: input, shape index: {}]   ;;  %s2688_s8 = inlined_call_operand.vmem [shape: bf16[32,8], index: 8, kind: input, shape index: {}]   ;;  %s2689_s9 = inlined_call_operand.vmem [shape: bf16[32,32], index: 9, kind: input, shape index: {}]   ;;  %s2690_s10 = inlined_call_operand.vmem [shape: bf16[32,32], index: 10, kind: input, shape index: {}]   ;;  %s2691_s11 = inlined_call_operand.vmem [shape: bf16[32,32], index: 11, kind: input, shape index: {}]   ;;  %s2692_s12 = inlined_call_operand.vmem [shape: bf16[33,32], index: 12, kind: input, shape index: {}]   ;;  %s2693_s13 = inlined_call_operand.vmem [shape: bf16[16,32], index: 13, kind: input, shape index: {}]   ;;  %s2694_s14 = inlined_call_operand.vmem [shape: bf16[16,8], index: 14, kind: input, shape index: {}]   ;;  %s2695_s15 = inlined_call_operand.vmem [shape: bf16[3,16], index: 15, kind: input, shape index: {}]   ;;  %s2696_s16 = inlined_call_operand.vmem [shape: f32[2,3,128], index: 16, kind: output, shape index: {0}]   ;;  %s2697_s17 = inlined_call_operand.hbm [shape: f32[2,1,128], index: 17, kind: output, shape index: {1}]  }
   0x1   :  { %2702 = sst [smem:[#allocation10_spill]] %s2680_s0 }
   0x2   :  { %2703 = sst [smem:[#allocation11_spill]] %s2681_s1 }
   0x3   :  { %2704 = sst [smem:[#allocation12_spill]] %s2682_s2 }
   0x4   :  { %2705 = sst [smem:[#allocation13_spill]] %s2683_s3 }
   0x5   :  { %2706 = sst [smem:[#allocation14_spill]] %s2684_s4 }
   0x6   :  { %23 = vsyncpa [#allocation3], 0 }
   0x7   :  { %25 = vsyncpa [#allocation3 + $0x1], 0  ;;  %s2372_s24 = smov 0   ;;  %s2374_s25 = smov 0  }
   0x8   :  { %s2376_s26 = smov 0   ;;  %s2378_s27 = smov 0  }
   0x9   :  { %s2380_s28 = smov 0   ;;  %s2382_s29 = smov 0  }
   0xa LB: > { %2707 = sst [smem:[#allocation5_spill]] %s2254_s26  ;;  %s1855_s0 = sadd.s32 4294967295, %s2266_s29   ;;  %s2266_s29 = sphi %s2382_s29, %s31_s29   ;;  %s2262_s28 = sphi %s2380_s28, %s2723_s28   ;;  %s2258_s27 = sphi %s2378_s27, %s2722_s27   ;;  %s2254_s26 = sphi %s2376_s26, %s2721_s26   ;;  %s2250_s25 = sphi %s2374_s25, %s2725_s25   ;;  %s2246_s24 = sphi %s2372_s24, %s2724_s24  }
   0xb   : > { %2708 = sst [smem:[#allocation6_spill]] %s2262_s28  ;;  %s1856_s30 = sadd.s32 4294967294, %s2266_s29  }
   0xc   : > { %s43_s18 = sadd.s32 1, %s2262_s28  ;;  %s430_s19 = sadd.s32 1, %s2254_s26 }
   0xd   : > { %p45_p0 = scmp.ge.s32.totalorder %s43_s18, 2  ;;  %p440_p1 = scmp.ne.s32.totalorder %s2254_s26, %s2250_s25 }
   0xe   : > { %p441_p2 = scmp.eq.s32.totalorder %s1855_s0, 1  ;;  %p446_p3 = scmp.ne.s32.totalorder %s2250_s25, %s2246_s24 }
   0xf   : > { %s2727_s18 = smov (%p45_p0, %s43_s18), 0  ;;  %p447_p5 = scmp.eq.s32.totalorder %s1856_s30, 1 }
  0x10   : > { %2709 = sst [smem:[#allocation7_spill]] %s2727_s18  ;;  %p2412_p4 = por %p441_p2, %p440_p1 }
  0x11   : > { %s425_s20 = ssub.s32 %s2262_s28, %s2727_s18  ;;  %p1859_p6 = scmp.ge.s32.totalorder %s2266_s29, 1 }
  0x12   : > { %p428_p7 = scmp.eq.s32.totalorder %s425_s20, 0  ;;  %p2419_p8 = por %p447_p5, %p446_p3 }
  0x13   : > { %p527_p9 = scmp.lt.s32.totalorder %s2266_s29, 3 }
  0x14   : > { %s2711_s21 = scalar_select %p2419_p8, 1, 0 }
  0x15   : > { %s2425_s22 = scalar_select %p428_p7, %s2254_s26, %s430_s19  }
  0x16   : > { %2712 = sst [smem:[#allocation8_spill]] %s2711_s21  ;;  %p528_p10 = pnand %p1859_p6, %p527_p9 }
  0x17   : > { %2713 = sst [smem:[#allocation9_spill]] %s2425_s22  ;;  %p594_p11 = scmp.lt.s32.totalorder (!%p528_p10), %s2258_s27, 1  ;;  %vm659_vm0 = vcmask (!%p528_p10), 64512   ;;  %v2268_v3 = vmov (!%p528_p10), 0   ;;  %vm666_vm1 = vcmask (!%p528_p10), 1043456   ;;  %vm755_vm2 = vcmask (!%p528_p10), 261120  }
  0x18   : > { %531 = sbr.rel (%p528_p10) target bundleno = 2580 (0xa14), region = 84  ;;  %s2714_s3 = sld [smem:[#allocation13_spill]] (!%p528_p10)  ;;  %2138 = vset.pattern.permute.xlu0 (!%p528_p10), %v2268_v3  ;;  %2139 = vset.pattern.permute.xlu1 (!%p528_p10), %v2268_v3  ;;  %v2269_v11 = vmov (!%p528_p10), 1   ;;  %v2165_v31 = vld [vmem:[%s2685_s5] sm:$0xff] (!%p528_p10)   ;;  %v2270_v32 = vmov (!%p528_p10), 2   ;;  %v2166_v51 = vld [vmem:[%s2685_s5 + $0x8] sm:$0xff] (!%p528_p10)  }
  0x19   : > { %s2715_s2 = sld [smem:[#allocation12_spill]] (!%p528_p10)  ;;  %s2716_s26 = sld [smem:[#allocation10_spill]] (!%p528_p10)  ;;  %v2167_v52 = vld [vmem:[%s2686_s6] sm:$0xff] (!%p528_p10)   ;;  %v2271_v53 = vmov (!%p528_p10), 3   ;;  %vm2277_vm3 = vmmov (!%p528_p10), 0   ;;  %vm1665_vm4 = vcmask (!%p528_p10), 130048  }
  0x1a   : > { %s2717_s4 = sld [smem:[#allocation14_spill]] (!%p528_p10)  ;;  %s2718_s23 = sld [smem:[#allocation11_spill]] (!%p528_p10) }
  0x1e   : > { %v2161_v0 = vld [vmem:[%s2714_s3] sm:$0xff] (!%p528_p10)   ;;  %v2162_v9 = vld [vmem:[%s2714_s3 + $0x8] sm:$0xff] (!%p528_p10)  }
  0x1f   : > { %s2432_s30 = scalar_select %p594_p11, %s2258_s27, 1  ;;  %v2437_v1 = vld [vmem:[%s2715_s2] sm:$0xff]  ;;  %v2442_v2 = vld [vmem:[%s2715_s2 + $0x10] sm:$0xff]  ;;  %1962 = vmatprep.mubr.msk.bf16.mxu0 %vm659_vm0, %v2161_v0  ;;  %v2448_v4 = vld [vmem:[%s2715_s2 + $0x8] sm:$0xff] }
  0x20   : > { %631 = vperm.xlu0 %2138, %v2437_v1   ;;  %v2455_v5 = vld [vmem:[%s2715_s2 + $0x18] sm:$0xff]  ;;  %641 = vperm.xlu1 %2139, %v2442_v2   ;;  %v2163_v10 = vld [vmem:[%s2717_s4] sm:$0xff]   ;;  %v2164_v30 = vld [vmem:[%s2717_s4 + $0x8] sm:$0xff]  }
  0x21   : > { %s1860_s22 = sshll.u32 %s2432_s30, 3  ;;  %1970 = vmatprep.mubr.msk.bf16.mxu1 %vm755_vm2, %v2163_v10 }
  0x22   : > { %s600_s21 = scalar_lea.vmem %s2716_s26, %s1860_s22  ;;  %s607_s0 = scalar_lea.vmem %s2718_s23, %s1860_s22 }
  0x23   : > { %v621_v6 = vld [vmem:[%s600_s21] sm:$0xff]  ;;  %s592_s21 = sand.u32 1, %s2250_s25   ;;  %s1911_s22 = sshll.u32 %s2258_s27, 4 }
  0x24   : > { %v2463_v7 = vpack.c.bf16 %v621_v6, %v621_v6  ;;  %636 = vperm.xlu0 %2138, %v2448_v4   ;;  %646 = vperm.xlu1 %2139, %v2455_v5   ;;  %s593_s18 = scalar_lea.vmem [#allocation2], %s592_s21  ;;  %s2635_s23 = scalar_lea.hbm %s2697_s17, %s1911_s22 }
  0x25   : > { %s1742_s20 = sshll.u32 %s593_s18, 4  ;;  %s1743_s20 = int_to_ptr.vmem [resolvable:$true] %s1742_s20 }
  0x26   : > { %2068 = vmatprep.subr.msk.bf16.mxu0 %vm666_vm1, %v2463_v7  ;;  %v2470_v8 = vsel %vm666_vm1, %v2463_v7, 0  ;;  %s2188_s26 = scalar_lea.vmem %s1743_s20, 16 }
  0x27   : > { %1961 = vmatpush3.bf16.msra.mxu0 %v2470_v8  ;;  %p2189_p12 = scmp.ne.s32.totalorder %s1743_s20, %s2188_s26 }
  0x28   : > { %2141 = vset.pattern.permute.xlu1 %v2269_v11  ;;  %2140 = vset.pattern.permute.xlu0 %v2269_v11 }
  0x29   : > { %734 = vperm.xlu1 %2141, %v2448_v4   ;;  %730 = vperm.xlu0 %2140, %v2437_v1   ;;  %p2190_p13 = pnand %p2189_p12, %p2412_p4 }
  0x2a   : > { %1963 = vmatmul.mubr.msk.bf16.vlgmr.msra.gmra.mrb[0].mxu0 %vm659_vm0, %v2162_v9 }
  0x2b   : > { %1978 = vmatprep.mubr.msk.bf16.mxu0 %vm755_vm2, %v2165_v31  ;;  %p2191_p0 = pneg %p2190_p13 }
  0x2d   : > { %738 = vperm.xlu1 %2141, %v2442_v2   ;;  %742 = vperm.xlu0 %2140, %v2455_v5  }
  0x31   : > { %2142 = vset.pattern.permute.xlu1 %v2270_v32  ;;  %2143 = vset.pattern.permute.xlu0 %v2270_v32 }
  0x32   : > { %822 = vperm.xlu1 %2142, %v2437_v1   ;;  %826 = vperm.xlu0 %2143, %v2448_v4  }
  0x36   : > { %830 = vperm.xlu1 %2142, %v2442_v2   ;;  %2144 = vset.pattern.permute.xlu0 %v2271_v53 }
  0x37   : > { %913 = vperm.xlu0 %2144, %v2437_v1  }
  0x3a   : > { %834 = vperm.xlu1 %2142, %v2455_v5  }
  0x3b   : > { %925 = vperm.xlu0 %2144, %v2455_v5  }
  0x3e   : > { %2145 = vset.pattern.permute.xlu1 %v2271_v53 }
  0x3f   : > { %917 = vperm.xlu1 %2145, %v2448_v4  }
  0x43   : > { %921 = vperm.xlu1 %2145, %v2442_v2  }
  0x9f   : > { %v642_v12 = vpop.permute.xlu1 %641  ;;  %v632_v13 = vpop.permute.xlu0 %631 }
  0xa3   : > { %v647_v15 = vpop.permute.xlu1 %646  ;;  %v637_v20 = vpop.permute.xlu0 %636 }
  0xa8   : > { %v735_v33 = vpop.permute.xlu1 %734  ;;  %v731_v34 = vpop.permute.xlu0 %730 }
  0xac   : > { %v739_v35 = vpop.permute.xlu1 %738  ;;  %v743_v37 = vpop.permute.xlu0 %742 }
  0xb1   : > { %v823_v54 = vpop.permute.xlu1 %822  ;;  %v827_v59 = vpop.permute.xlu0 %826 }
  0xb5   : > { %v831_v55 = vpop.permute.xlu1 %830 }
  0xb9   : > { %v835_v60 = vpop.permute.xlu1 %834 }
  0xfd   : > { %v1964_v14 = vpop.f32.mrb[0].mxu0 }
  0xfe   : > { %v713_v16 = vadd.f32 %v1964_v14, %v642_v12  ;;  %v704_v17 = vpop.f32.mrb[1].mxu0  ;;  %v2168_v14 = vld [vmem:[%s2686_s6 + $0x8] sm:$0xff]  }
  0xff   : > { %v705_v18 = vadd.f32 %v704_v17, %v632_v13  ;;  %v1965_v19 = vpop.f32.mrb[2].mxu0  ;;  %v918_v17 = vpop.permute.xlu1 %917 }
 0x100   : > { %v716_v21 = vadd.f32 %v1965_v19, %v647_v15  ;;  %v707_v22 = vpop.f32.mrb[3].mxu0  ;;  %v721_v24 = vmax.f32 %v713_v16, 0.0  ;;  %v2169_v15 = vld [vmem:[%s2687_s7] sm:$0xff]   ;;  %v2272_v16 = vmov 4  }
 0x101   : > { %v708_v23 = vadd.f32 %v707_v22, %v637_v20  ;;  %v719_v26 = vmax.f32 %v705_v18, 0.0  ;;  %2146 = vset.pattern.permute.xlu1 %v2272_v16  ;;  %2147 = vset.pattern.permute.xlu0 %v2272_v16  ;;  %v914_v18 = vpop.permute.xlu0 %913 }
 0x102   : > { %v722_v25 = vmax.f32 %v716_v21, 0.0  ;;  %1004 = vperm.xlu1 %2146, %v2437_v1   ;;  %1008 = vperm.xlu0 %2147, %v2448_v4  }
 0x103   : > { %v720_v27 = vmax.f32 %v708_v23, 0.0  ;;  %v922_v19 = vpop.permute.xlu1 %921 }
 0x104   : > { %v724_v28 = vpack.c.bf16 %v722_v25, %v721_v24 }
 0x105   : > { %v723_v29 = vpack.c.bf16 %v720_v27, %v719_v26  ;;  %v926_v21 = vpop.permute.xlu0 %925 }
 0x106   : > { %1012 = vperm.xlu1 %2146, %v2442_v2  }
 0x107   : > { %1966 = vmatprep.subr.bf16.mxu1 %v723_v29 }
 0x108   : > { %1967 = vmatpush3.bf16.msra.mxu1 %v723_v29 }
 0x109   : > { %1968 = vmatprep.subr.bf16.mxu1 %v724_v28 }
 0x10a   : > { %1016 = vperm.xlu1 %2146, %v2455_v5  }
 0x10c   : > { %1969 = vmatpush3.bf16.msra.mxu1 %v724_v28 }
 0x10f   : > { %1971 = vmatmul.mubr.msk.bf16.vlgmr.msra.gmra.mrb[0].mxu1 %vm755_vm2, %v2164_v30 }
 0x110   : > { %1986 = vmatprep.mubr.msk.bf16.mxu1 %vm755_vm2, %v2167_v52 }
 0x1e2   : > { %v1972_v36 = vpop.f32.mrb[0].mxu1 }
 0x1e3   : > { %v805_v38 = vadd.f32 %v1972_v36, %v739_v35  ;;  %v796_v39 = vpop.f32.mrb[1].mxu1  ;;  %v2170_v35 = vld [vmem:[%s2687_s7 + $0x8] sm:$0xff]   ;;  %v2171_v36 = vld [vmem:[%s2689_s9] sm:$0xff]  }
 0x1e4   : > { %v797_v40 = vadd.f32 %v796_v39, %v731_v34  ;;  %v1973_v41 = vpop.f32.mrb[2].mxu1 }
 0x1e5   : > { %v808_v42 = vadd.f32 %v1973_v41, %v743_v37  ;;  %v799_v43 = vpop.f32.mrb[3].mxu1  ;;  %v813_v45 = vmax.f32 %v805_v38, 0.0  ;;  %v2273_v37 = vmov 5   ;;  %v1005_v38 = vpop.permute.xlu1 %1004 }
 0x1e6   : > { %v800_v44 = vadd.f32 %v799_v43, %v735_v33  ;;  %v811_v47 = vmax.f32 %v797_v40, 0.0  ;;  %2149 = vset.pattern.permute.xlu1 %v2273_v37  ;;  %2148 = vset.pattern.permute.xlu0 %v2273_v37  ;;  %v1009_v43 = vpop.permute.xlu0 %1008 }
 0x1e7   : > { %v814_v46 = vmax.f32 %v808_v42, 0.0  ;;  %1233 = vperm.xlu1 %2149, %v2448_v4   ;;  %1229 = vperm.xlu0 %2148, %v2437_v1  }
 0x1e8   : > { %v812_v48 = vmax.f32 %v800_v44, 0.0 }
 0x1e9   : > { %v816_v49 = vpack.c.bf16 %v814_v46, %v813_v45  ;;  %v1013_v39 = vpop.permute.xlu1 %1012 }
 0x1ea   : > { %v815_v50 = vpack.c.bf16 %v812_v48, %v811_v47 }
 0x1eb   : > { %1237 = vperm.xlu1 %2149, %v2442_v2   ;;  %1241 = vperm.xlu0 %2148, %v2455_v5  }
 0x1ec   : > { %1974 = vmatprep.subr.bf16.mxu0 %v815_v50 }
 0x1ed   : > { %1975 = vmatpush3.bf16.msra.mxu0 %v815_v50  ;;  %v1017_v44 = vpop.permute.xlu1 %1016 }
 0x1ee   : > { %1976 = vmatprep.subr.bf16.mxu0 %v816_v49 }
 0x1f1   : > { %1977 = vmatpush3.bf16.msra.mxu0 %v816_v49 }
 0x1f4   : > { %1979 = vmatmul.mubr.msk.bf16.vlgmr.msra.gmra.mrb[4].mxu0 %vm755_vm2, %v2166_v51 }
 0x1f5   : > { %1994 = vmatprep.mubr.msk.bf16.mxu0 %vm755_vm2, %v2169_v15 }
 0x2c7   : > { %v1980_v56 = vpop.f32.mrb[4].mxu0 }
 0x2c8   : > { %v896_v57 = vadd.f32 %v1980_v56, %v831_v55  ;;  %v887_v58 = vpop.f32.mrb[5].mxu0  ;;  %v2172_v56 = vld [vmem:[%s2689_s9 + $0x8] sm:$0xff]  }
 0x2c9   : > { %v888_v61 = vadd.f32 %v887_v58, %v823_v54  ;;  %v1981_v62 = vpop.f32.mrb[6].mxu0  ;;  %v2174_v58 = vld [vmem:[%s2688_s8 + $0x8] sm:$0xff]  }
 0x2ca   : > { %v899_v63 = vadd.f32 %v1981_v62, %v835_v60  ;;  %v890_v0 = vpop.f32.mrb[7].mxu0  ;;  %v904_v6 = vmax.f32 %v896_v57, 0.0  ;;  %v2173_v57 = vld [vmem:[%s2688_s8] sm:$0xff]   ;;  %v2274_v60 = vmov 6  }
 0x2cb   : > { %v891_v3 = vadd.f32 %v890_v0, %v827_v59  ;;  %v902_v10 = vmax.f32 %v888_v61, 0.0  ;;  %v2175_v59 = vld [vmem:[%s2690_s10] sm:$0xff]   ;;  %2150 = vset.pattern.permute.xlu1 %v2274_v60  ;;  %2151 = vset.pattern.permute.xlu0 %v2274_v60  ;;  %v2180_v60 = vld [vmem:[%s2692_s12 + $0x8] sm:$0xff]  }
 0x2cc   : > { %v905_v9 = vmax.f32 %v899_v63, 0.0  ;;  %1259 = vperm.xlu1 %2150, %v2437_v1   ;;  %1263 = vperm.xlu0 %2151, %v2448_v4  }
 0x2cd   : > { %v903_v11 = vmax.f32 %v891_v3, 0.0 }
 0x2ce   : > { %v907_v12 = vpack.c.bf16 %v905_v9, %v904_v6 }
 0x2cf   : > { %v906_v13 = vpack.c.bf16 %v903_v11, %v902_v10 }
 0x2d0   : > { %1267 = vperm.xlu1 %2150, %v2442_v2  }
 0x2d1   : > { %1982 = vmatprep.subr.bf16.mxu1 %v906_v13 }
 0x2d2   : > { %1983 = vmatpush3.bf16.msra.mxu1 %v906_v13 }
 0x2d3   : > { %1984 = vmatprep.subr.bf16.mxu1 %v907_v12 }
 0x2d4   : > { %1271 = vperm.xlu1 %2150, %v2455_v5  }
 0x2d6   : > { %1985 = vmatpush3.bf16.msra.mxu1 %v907_v12 }
 0x2d9   : > { %1987 = vmatmul.mubr.msk.bf16.vlgmr.msra.gmra.mrb[4].mxu1 %vm755_vm2, %v2168_v14 }
 0x2da   : > { %2002 = vmatprep.mubr.msk.bf16.mxu1 %vm755_vm2, %v2171_v36 }
 0x3ac   : > { %v1988_v20 = vpop.f32.mrb[4].mxu1 }
 0x3ad   : > { %v987_v22 = vadd.f32 %v1988_v20, %v922_v19  ;;  %v978_v23 = vpop.f32.mrb[5].mxu1  ;;  %v2176_v19 = vld [vmem:[%s2690_s10 + $0x8] sm:$0xff]   ;;  %v2177_v20 = vld [vmem:[%s2691_s11] sm:$0xff]  }
 0x3ae   : > { %v979_v24 = vadd.f32 %v978_v23, %v914_v18  ;;  %v1989_v25 = vpop.f32.mrb[6].mxu1 }
 0x3af   : > { %v990_v26 = vadd.f32 %v1989_v25, %v926_v21  ;;  %v981_v27 = vpop.f32.mrb[7].mxu1  ;;  %v995_v29 = vmax.f32 %v987_v22, 0.0  ;;  %v2275_v21 = vmov 7  }
 0x3b0   : > { %v982_v28 = vadd.f32 %v981_v27, %v918_v17  ;;  %v993_v31 = vmax.f32 %v979_v24, 0.0  ;;  %2153 = vset.pattern.permute.xlu1 %v2275_v21  ;;  %2152 = vset.pattern.permute.xlu0 %v2275_v21 }
 0x3b1   : > { %v996_v30 = vmax.f32 %v990_v26, 0.0  ;;  %1354 = vperm.xlu1 %2153, %v2448_v4   ;;  %1350 = vperm.xlu0 %2152, %v2437_v1  }
 0x3b2   : > { %v994_v32 = vmax.f32 %v982_v28, 0.0 }
 0x3b3   : > { %v998_v33 = vpack.c.bf16 %v996_v30, %v995_v29 }
 0x3b4   : > { %v997_v34 = vpack.c.bf16 %v994_v32, %v993_v31 }
 0x3b5   : > { %1358 = vperm.xlu1 %2153, %v2442_v2   ;;  %1362 = vperm.xlu0 %2152, %v2455_v5  }
 0x3b6   : > { %1990 = vmatprep.subr.bf16.mxu0 %v997_v34 }
 0x3b7   : > { %1991 = vmatpush3.bf16.msra.mxu0 %v997_v34 }
 0x3b8   : > { %1992 = vmatprep.subr.bf16.mxu0 %v998_v33 }
 0x3bb   : > { %1993 = vmatpush3.bf16.msra.mxu0 %v998_v33 }
 0x3be   : > { %1995 = vmatmul.mubr.msk.bf16.vlgmr.msra.gmra.mrb[8].mxu0 %vm755_vm2, %v2170_v35 }
 0x3bf   : > { %2016 = vmatprep.mubr.msk.bf16.mxu0 %vm755_vm2, %v2175_v59 }
 0x491   : > { %v1996_v40 = vpop.f32.mrb[8].mxu0 }
 0x492   : > { %v1078_v41 = vadd.f32 %v1996_v40, %v1013_v39  ;;  %v1069_v42 = vpop.f32.mrb[9].mxu0  ;;  %v2178_v40 = vld [vmem:[%s2691_s11 + $0x8] sm:$0xff]  }
 0x493   : > { %v1070_v45 = vadd.f32 %v1069_v42, %v1005_v38  ;;  %v1997_v46 = vpop.f32.mrb[10].mxu0  ;;  %v2278_v42 = vmov 8  }
 0x494   : > { %v1081_v47 = vadd.f32 %v1997_v46, %v1017_v44  ;;  %v1072_v48 = vpop.f32.mrb[11].mxu0  ;;  %v1086_v50 = vmax.f32 %v1078_v41, 0.0  ;;  %v2276_v41 = vmov 0.0   ;;  %2154 = vset.pattern.permute.xlu1 %v2278_v42  ;;  %2155 = vset.pattern.permute.xlu0 %v2278_v42 }
 0x495   : > { %v1073_v49 = vadd.f32 %v1072_v48, %v1009_v43  ;;  %v1084_v52 = vmax.f32 %v1070_v45, 0.0  ;;  %1442 = vperm.xlu1 %2154, %v2437_v1   ;;  %1446 = vperm.xlu0 %2155, %v2448_v4  }
 0x496   : > { %v1087_v51 = vmax.f32 %v1081_v47, 0.0 }
 0x497   : > { %v1085_v53 = vmax.f32 %v1073_v49, 0.0 }
 0x498   : > { %v1089_v54 = vpack.c.bf16 %v1087_v51, %v1086_v50 }
 0x499   : > { %v1088_v55 = vpack.c.bf16 %v1085_v53, %v1084_v52  ;;  %1450 = vperm.xlu1 %2154, %v2442_v2  }
 0x49b   : > { %1998 = vmatprep.subr.bf16.mxu1 %v1088_v55 }
 0x49c   : > { %1999 = vmatpush3.bf16.msra.mxu1 %v1088_v55 }
 0x49d   : > { %2000 = vmatprep.subr.bf16.mxu1 %v1089_v54  ;;  %1454 = vperm.xlu1 %2154, %v2455_v5   ;;  %v2179_v5 = vld [vmem:[%s2692_s12] sm:$0xff]  }
 0x4a0   : > { %2001 = vmatpush3.bf16.msra.mxu1 %v1089_v54 }
 0x4a1   : > { %2069 = vmatprep.subr.msk.bf16.mxu1 %vm666_vm1, %v2463_v7  ;;  %v1234_v7 = vpop.permute.xlu1 %1233 }
 0x4a3   : > { %2003 = vmatmul.mubr.msk.bf16.vlgmr.msra.gmra.mrb[8].mxu1 %vm755_vm2, %v2172_v56 }
 0x4a4   : > { %2007 = vmatpush3.bf16.msra.mxu1 %v2470_v8  ;;  %2008 = vmatprep.mubr.msk.bf16.mxu1 %vm659_vm0, %v2173_v57  ;;  %v1230_v8 = vpop.permute.xlu0 %1229 }
 0x4a5   : > { %v1238_v61 = vpop.permute.xlu1 %1237  ;;  %2028 = vmatprep.subr.bf16.mxu1 %v2276_v41 }
 0x4a8   : > { %v1242_v63 = vpop.permute.xlu0 %1241 }
 0x4a9   : > { %v1260_v22 = vpop.permute.xlu1 %1259 }
 0x4ac   : > { %v1264_v27 = vpop.permute.xlu0 %1263 }
 0x4ad   : > { %v1268_v23 = vpop.permute.xlu1 %1267 }
 0x4af   : > { %2009 = vmatmul.mubr.msk.bf16.vlgmr.msra.gmra.mrb[8].mxu1 %vm659_vm0, %v2174_v58 }
 0x4b0   : > { %2032 = vmatprep.mubr.msk.bf16.mxu1 %vm2277_vm3, %v2276_v41  ;;  %v1351_v44 = vpop.permute.xlu0 %1350 }
 0x4b1   : > { %v1272_v28 = vpop.permute.xlu1 %1271 }
 0x4b4   : > { %v1363_v47 = vpop.permute.xlu0 %1362 }
 0x4b5   : > { %v1355_v43 = vpop.permute.xlu1 %1354 }
 0x4b9   : > { %v1359_v45 = vpop.permute.xlu1 %1358 }
 0x582   : > { %v2010_v62 = vpop.f32.mrb[8].mxu1 }
 0x583   : > { %v1246_v0 = vadd.f32 %v2010_v62, %v1238_v61  ;;  %v1213_v3 = vpop.f32.mrb[9].mxu1  ;;  %v2181_v62 = vld [vmem:[%s2694_s14] sm:$0xff]  }
 0x584   : > { %v1244_v6 = vadd.f32 %v1230_v8, %v1213_v3  ;;  %v2011_v9 = vpop.f32.mrb[10].mxu1 }
 0x585   : > { %v1247_v10 = vadd.f32 %v2011_v9, %v1242_v63  ;;  %v1216_v11 = vpop.f32.mrb[11].mxu1  ;;  %v1250_v13 = vmax.f32 %v1246_v0, 0.0  ;;  %v2279_v63 = vmov 9   ;;  %v1443_v0 = vpop.permute.xlu1 %1442 }
 0x586   : > { %v1245_v12 = vadd.f32 %v1234_v7, %v1216_v11  ;;  %v1248_v15 = vmax.f32 %v1244_v6, 0.0  ;;  %v623_v7 = vld [vmem:[%s607_s0] sm:$0xff]  ;;  %2156 = vset.pattern.permute.xlu0 %v2279_v63  ;;  %2157 = vset.pattern.permute.xlu1 %v2279_v63  ;;  %v1447_v6 = vpop.permute.xlu0 %1446  ;;  %s1726_s0 = scalar_lea.sflag [#allocation3], %s592_s21 }
 0x587   : > { %v1251_v14 = vmax.f32 %v1247_v10, 0.0  ;;  %v624_v8 = vpack.c.bf16 %v623_v7, %v623_v7  ;;  %1648 = vperm.xlu0 %2156, %v2437_v1   ;;  %1652 = vperm.xlu1 %2157, %v2448_v4  }
 0x588   : > { %v1249_v16 = vmax.f32 %v1245_v12, 0.0 }
 0x589   : > { %v1253_v17 = vpack.c.bf16 %v1251_v14, %v1250_v13  ;;  %v1555_v61 = vsel %vm666_vm1, %v624_v8, 0  ;;  %v1451_v14 = vpop.permute.xlu1 %1450 }
 0x58a   : > { %v1252_v18 = vpack.c.bf16 %v1249_v16, %v1248_v15 }
 0x58b   : > { %2159 = vset.pattern.permute.xlu0 %v2278_v42 }
 0x58c   : > { %2012 = vmatprep.subr.bf16.mxu0 %v1252_v18 }
 0x58d   : > { %2013 = vmatpush3.bf16.msra.mxu0 %v1252_v18  ;;  %v1455_v18 = vpop.permute.xlu1 %1454 }
 0x58e   : > { %2014 = vmatprep.subr.bf16.mxu0 %v1253_v17 }
 0x591   : > { %2015 = vmatpush3.bf16.msra.mxu0 %v1253_v17 }
 0x594   : > { %2017 = vmatmul.mubr.msk.bf16.vlgmr.msra.gmra.mrb[12].mxu0 %vm755_vm2, %v2176_v19 }
 0x595   : > { %2024 = vmatprep.mubr.msk.bf16.mxu0 %vm755_vm2, %v2177_v20 }
 0x667   : > { %v2018_v24 = vpop.f32.mrb[12].mxu0 }
 0x668   : > { %v1333_v25 = vadd.f32 %v2018_v24, %v1268_v23  ;;  %v1324_v26 = vpop.f32.mrb[13].mxu0  ;;  %v2182_v23 = vld [vmem:[%s2693_s13] sm:$0xff]  }
 0x669   : > { %v1325_v29 = vadd.f32 %v1324_v26, %v1260_v22  ;;  %v2019_v30 = vpop.f32.mrb[14].mxu0 }
 0x66a   : > { %v1336_v31 = vadd.f32 %v2019_v30, %v1272_v28  ;;  %v1327_v32 = vpop.f32.mrb[15].mxu0  ;;  %v1341_v34 = vmax.f32 %v1333_v25, 0.0  ;;  %v2183_v28 = vld [vmem:[%s2692_s12 + $0x10] ss:$0 sps:$4 sm:$0x11]   ;;  %v2280_v30 = vmov 10  }
 0x66b   : > { %v1328_v33 = vadd.f32 %v1327_v32, %v1264_v27  ;;  %v1339_v36 = vmax.f32 %v1325_v29, 0.0  ;;  %v620_v29 = vld [vmem:[%s2715_s2 + $0x20] sm:$0x1]  ;;  %2158 = vset.pattern.permute.xlu1 %v2280_v30  ;;  %v1649_v32 = vpop.permute.xlu0 %1648  ;;  %s2281_s2 = smov [#allocation2]  }
 0x66c   : > { %v1342_v35 = vmax.f32 %v1336_v31, 0.0  ;;  %1459 = vperm.xlu0 %2159, %v620_v29   ;;  %1662 = vperm.xlu1 %2158, %v2437_v1   ;;  %v1660_v1 = vld [vmem:[%s2695_s15] sm:$0x3]  ;;  %s2192_s3 = sshll.u32 %s2281_s2, 4  ;;  %s2193_s3 = int_to_ptr.vmem [resolvable:$false] %s2192_s3 }
 0x66d   : > { %v1340_v37 = vmax.f32 %v1328_v33, 0.0  ;;  %s2194_s4 = scalar_lea.vmem %s2193_s3, 32  ;;  %p2195_p1 = scmp.lt.s32.totalorder %s1743_s20, %s2193_s3 }
 0x66e   : > { %v1344_v38 = vpack.c.bf16 %v1342_v35, %v1341_v34  ;;  %p2196_p2 = scmp.lt.s32.totalorder %s2194_s4, %s2188_s26 }
 0x66f   : > { %v1343_v39 = vpack.c.bf16 %v1340_v37, %v1339_v36  ;;  %v1653_v36 = vpop.permute.xlu1 %1652 }
 0x670   : > { %2160 = vset.pattern.permute.xlu0 %v2280_v30  ;;  %p2197_p3 = por %p2196_p2, %p2195_p1 }
 0x671   : > { %2020 = vmatprep.subr.bf16.mxu0 %v1343_v39 }
 0x672   : > { %2021 = vmatpush3.bf16.msra.mxu0 %v1343_v39  ;;  %p2198_p5 = pnand %p2197_p3, %p2191_p0 }
 0x673   : > { %2022 = vmatprep.subr.bf16.mxu0 %v1344_v38 }
 0x676   : > { %2023 = vmatpush3.bf16.msra.mxu0 %v1344_v38 }
 0x677   : > { %2044 = vmatprep.subr.bf16.mxu0 %v2276_v41 }
 0x679   : > { %2025 = vmatmul.mubr.msk.bf16.vlgmr.msra.gmra.mrb[16].mxu0 %vm755_vm2, %v2178_v40 }
 0x67a   : > { %2046 = vmatprep.mubr.msk.bf16.mxu0 %vm2277_vm3, %v2276_v41  ;;  %2045 = vmatpush3.bf16.msra.mxu0 %v1555_v61 }
 0x67b   : > { %2050 = vmatprep.subr.bf16.mxu0 %v2276_v41 }
 0x681   : > { %2047 = vmatmul.mubr.msk.bf16.vlgmr.msra.gmra.mrb[20].mxu0 %vm659_vm0, %v2181_v62 }
 0x682   : > { %2054 = vmatprep.mubr.msk.bf16.mxu0 %vm2277_vm3, %v2276_v41 }
 0x74c   : > { %v2026_v46 = vpop.f32.mrb[16].mxu0 }
 0x74d   : > { %v1424_v48 = vadd.f32 %v2026_v46, %v1359_v45  ;;  %v1415_v49 = vpop.f32.mrb[17].mxu0 }
 0x74e   : > { %v1416_v50 = vadd.f32 %v1415_v49, %v1351_v44  ;;  %v2027_v51 = vpop.f32.mrb[18].mxu0 }
 0x74f   : > { %v1427_v52 = vadd.f32 %v2027_v51, %v1363_v47  ;;  %v1418_v53 = vpop.f32.mrb[19].mxu0  ;;  %v1432_v55 = vmax.f32 %v1424_v48, 0.0  ;;  %v1460_v47 = vpop.permute.xlu0 %1459 }
 0x750   : > { %v1419_v54 = vadd.f32 %v1418_v53, %v1355_v43  ;;  %v1430_v57 = vmax.f32 %v1416_v50, 0.0 }
 0x751   : > { %v1433_v56 = vmax.f32 %v1427_v52, 0.0 }
 0x752   : > { %v1431_v58 = vmax.f32 %v1419_v54, 0.0 }
 0x753   : > { %v1435_v2 = vpack.c.bf16 %v1433_v56, %v1432_v55 }
 0x754   : > { %v1434_v59 = vpack.c.bf16 %v1431_v58, %v1430_v57  ;;  %v1591_v24 = vpop.f32.mrb[20].mxu0 }
 0x755   : > { %v2048_v25 = vpop.f32.mrb[21].mxu0 }
 0x756   : > { %2029 = vmatpush3.bf16.msra.mxu1 %v1434_v59  ;;  %v1594_v26 = vpop.f32.mrb[22].mxu0 }
 0x757   : > { %2030 = vmatprep.subr.bf16.mxu1 %v2276_v41  ;;  %v2049_v27 = vpop.f32.mrb[23].mxu0 }
 0x75a   : > { %2031 = vmatpush3.bf16.msra.mxu1 %v1435_v2 }
 0x75d   : > { %2033 = vmatmul.mubr.msk.bf16.vlgmr.msra.gmra.mrb[12].mxu1 %vm755_vm2, %v2179_v5 }
 0x75e   : > { %2036 = vmatprep.mubr.msk.bf16.mxu1 %vm2277_vm3, %v2276_v41 }
 0x765   : > { %2037 = vmatmul.mubr.msk.bf16.gmra.mrb[16].mxu1 %vm755_vm2, %v2180_v60 }
 0x766   : > { %2040 = vmatprep.mubr.msk.bf16.mxu1 %vm2277_vm3, %v2276_v41 }
 0x76d   : > { %2041 = vmatmul.mubr.msk.bf16.gmra.mrb[20].mxu1 %vm755_vm2, %v2183_v28 }
 0x830   : > { %v1518_v3 = vpop.f32.mrb[12].mxu1 }
 0x831   : > { %v2034_v9 = vpop.f32.mrb[13].mxu1  ;;  %v1519_v11 = vadd.f32 %v1518_v3, %v1443_v0 }
 0x832   : > { %v1521_v10 = vpop.f32.mrb[14].mxu1 }
 0x833   : > { %v1522_v12 = vadd.f32 %v1521_v10, %v1447_v6  ;;  %v2035_v13 = vpop.f32.mrb[15].mxu1 }
 0x835   : > { %v1540_v15 = vpack.c.bf16 %v1522_v12, %v1519_v11 }
 0x837   : > { %2051 = vmatpush3.bf16.msra.mxu0 %v1540_v15 }
 0x838   : > { %v1526_v16 = vpop.f32.mrb[16].mxu1  ;;  %2052 = vmatprep.subr.bf16.mxu0 %v2276_v41 }
 0x839   : > { %v2038_v17 = vpop.f32.mrb[17].mxu1  ;;  %v1527_v20 = vadd.f32 %v1526_v16, %v1451_v14 }
 0x83a   : > { %v1529_v19 = vpop.f32.mrb[18].mxu1 }
 0x83b   : > { %v1530_v4 = vadd.f32 %v1529_v19, %v1455_v18  ;;  %v2039_v21 = vpop.f32.mrb[19].mxu1 }
 0x83d   : > { %v1541_v22 = vpack.c.bf16 %v1530_v4, %v1527_v20 }
 0x83f   : > { %2053 = vmatpush3.bf16.msra.mxu0 %v1541_v22 }
 0x840   : > { %2058 = vmatprep.subr.bf16.mxu0 %v2276_v41  ;;  %v1534_v44 = vpop.f32.mrb[20].mxu1 }
 0x841   : > { %v2042_v45 = vpop.f32.mrb[21].mxu1  ;;  %v1535_v49 = vadd.f32 %v1534_v44, %v1460_v47 }
 0x842   : > { %2055 = vmatmul.mubr.msk.bf16.vlgmr.msra.gmra.mrb[24].mxu0 %vm755_vm2, %v2182_v23  ;;  %v1537_v46 = vpop.f32.mrb[22].mxu1 }
 0x843   : > { %2060 = vmatprep.mubr.msk.bf16.mxu0 %vm2277_vm3, %v2276_v41  ;;  %v2043_v48 = vpop.f32.mrb[23].mxu1  ;;  %v1709_v50 = vmax.f32 %v1535_v49, 0.0 }
 0x845   : > { %1710 = vst [vmem:[%s593_s18] sm:$0x1] %v1709_v50 }
 0x915   : > { %v1640_v31 = vpop.f32.mrb[24].mxu0 }
 0x916   : > { %v1641_v33 = vadd.f32 %v1640_v31, %v1591_v24  ;;  %v2056_v34 = vpop.f32.mrb[25].mxu0 }
 0x917   : > { %v1643_v35 = vpop.f32.mrb[26].mxu0 }
 0x918   : > { %v1655_v37 = vadd.f32 %v1649_v32, %v1641_v33  ;;  %v1644_v38 = vadd.f32 %v1643_v35, %v1594_v26  ;;  %v2057_v39 = vpop.f32.mrb[27].mxu0 }
 0x91a   : > { %v1656_v40 = vadd.f32 %v1653_v36, %v1644_v38  ;;  %v1657_v41 = vmax.f32 %v1655_v37, 0.0 }
 0x91c   : > { %v1658_v42 = vmax.f32 %v1656_v40, 0.0 }
 0x91e   : > { %v1659_v43 = vpack.c.bf16 %v1658_v42, %v1657_v41 }
 0x920   : > { %2059 = vmatpush3.bf16.msra.mxu0 %v1659_v43 }
 0x923   : > { %2061 = vmatmul.mubr.msk.bf16.vlgmr.msra.gmra.mrb[28].mxu0 %vm1665_vm4, %v1660_v1 }
 0x924   : > { %2201 = shalt.err (!%p2198_p5)
}
 0x925   : > { %s2202_s27 = scalar_lea.hbm %s2635_s23, 16  ;;  %s2206_s2 = scalar_lea.hbm %s2697_s17, 32 }
 0x926   : > { %p2203_p6 = scmp.ne.s32.totalorder %s2635_s23, %s2202_s27  ;;  %p2207_p10 = scmp.lt.u32.totalorder %s2635_s23, %s2697_s17 }
 0x927   : > { %p2208_p11 = scmp.lt.u32.totalorder %s2206_s2, %s2202_s27  ;;  %p2210_p13 = scmp.lt.u32.totalorder %s2202_s27, %s2635_s23 }
 0x928   : > { %p2204_p7 = pnand %p2203_p6, %p2412_p4 }
 0x929   : > { %p2209_p12 = por %p2208_p11, %p2207_p10 }
 0x92a   : > { %p2205_p9 = pneg %p2204_p7 }
 0x92b   : > { %p2211_p0 = por %p2210_p13, %p2209_p12 }
 0x92d   : > { %p2212_p1 = pnand %p2211_p0, %p2205_p9 }
 0x92f   : > { %2215 = shalt.err (!%p2212_p1)
}
 0x930   : > { %2070 = dma.vmem_to_hbm [thread:$0]  (%p2412_p4), %s1743_s20, 16, %s2635_s23, %s1726_s0   ;;  %v1663_v51 = vpop.permute.xlu1 %1662 }
 0x931   : > { %s1862_s4 = sshll.u32 %s2432_s30, 2 }
 0x932   : > { %s614_s26 = scalar_lea.vmem %s2696_s16, %s1862_s4 }
 0x9f6   : > { %v1703_v52 = vpop.f32.mrb[28].mxu0 }
 0x9f7   : > { %v2062_v53 = vpop.f32.mrb[29].mxu0  ;;  %v1704_v54 = vadd.f32 %v1703_v52, %v1663_v51 }
 0x9f8   : > { %v1706_v55 = vpop.f32.mrb[30].mxu0 }
 0x9f9   : > { %v1910_v56 = vmul.f32 -1.442695, %v1704_v54  ;;  %v2063_v57 = vpop.f32.mrb[31].mxu0 }
 0x9fb   : > { %2184 = vpow2.f32 %v1910_v56 }
 0xa05   : > { %v2185_v58 = vpop.eup %2184 }
 0xa06   : > { %v1714_v2 = vadd.f32 1.0, %v2185_v58 }
 0xa08   : > { %2186 = vrcp.f32 %v1714_v2 }
 0xa12   : > { %v2187_v59 = vpop.eup %2186 }
 0xa13   : > { %1717 = vst [vmem:[%s614_s26] sm:$0x7] %v2187_v59 }
 0xa14 PF: > { %p2076_p4 = scmp.ge.s32.totalorder %s2266_s29, 2  ;;  %s1764_s20 = sand.u32 1, %s2246_s24  }
 0xa15   : > { %s1765_s23 = scalar_lea.sflag [#allocation3], %s1764_s20 }
 0xa16   : > { %p2073_p2 = pnand %p2076_p4, %p2419_p8 }
 0xa18   : > { %2241 = dma.done.wait (!%p2073_p2), %s1765_s23, 16  }
 0xa19   : > { %2243 = vsyncadd (!%p2073_p2), %s1765_s23, 4294967280  ;;  %s31_s29 = sadd.s32 1, %s2266_s29   ;;  %s2720_s30 = sld [smem:[#allocation5_spill]] }
 0xa1a   : > { %p28_p3 = scmp.ge.s32.totalorder %s31_s29, 4   ;;  %s2721_s26 = sld [smem:[#allocation9_spill]] }
 0xa1b   : > { %s2722_s27 = sld [smem:[#allocation6_spill]]  ;;  %s2723_s28 = sld [smem:[#allocation7_spill]] }
 0xa1c   : > { %s2724_s24 = smov %s2250_s25  ;;  %30 = sbr.rel (!%p28_p3) target bundleno = 10 (0xa), region = 134 }
 0xa1f   : > { %s2725_s25 = smov %s2720_s30 }
 0xa23   :  { %1769 = vsyncpa [#allocation3], 1 }
 0xa24   :  { %1771 = vsyncpa [#allocation3 + $0x1], 1 }

</bundles_post_ra>
